<compile_context>
chip_gen: v7x
topology: tpu7x:2x2x1
jax: 0.10.0
libtpu: 0.0.40
codegen_flags: <defaults>
</compile_context>

<pallas_src>
import functools

import numpy as np
import jax
import jax.numpy as jnp
from jax import lax
from jax.experimental import pallas as pl
from jax.experimental.pallas import tpu as pltpu


# ----------------------------------------------------------------------------
# Fused kernel: conv1+relu+pool -> conv2+relu+pool -> (flatten folded) -> MLP
# Shapes per block:
#   x_ref  : (TB, C_in*L)      batch on sublanes, c-major/l-minor features on lanes
#   w1_ref : (C_in*L,  W1P)    conv1 as dense block-Toeplitz matrix (cols padded to 128x)
#   b1_ref : (1, W1P)          f32
#   w2_ref : (W1P, W2P)        conv2 matrix with pool1 even-lane selection folded in
#   b2_ref : (1, W2P)          f32
#   l1_ref : (W2P, N1)         linear1 (in,out) with pool2 even-lane selection folded in
#   lb1_ref: (1, N1)           f32
#   l2_ref : (N1, N2)          linear2 (in,out)
#   lb2_ref: (1, N2)           f32
#   o_ref  : (TB, N2)
# ----------------------------------------------------------------------------
def fused_cnn_kernel(x_ref, w1_ref, b1_ref, w2_ref, b2_ref,
                     l1_ref, lb1_ref, l2_ref, lb2_ref, o_ref):
    f32 = jnp.float32
    cdt = w1_ref.dtype                      # compute dtype for MXU operands (bf16/f32)

    def pool_pair(h):
        # MaxPool1d(2,2) pairwise max: lane m gets max(h[m], h[m+1]).
        # Only even lanes within each channel segment are consumed downstream (the
        # even-lane selection is folded into the next weight matrix), so the wraparound
        # at the last lane and the odd-lane garbage never matter.
        w = h.shape[-1]
        return jnp.maximum(h, pltpu.roll(h, shift=w - 1, axis=1))

    x = x_ref[...].astype(cdt)                                            # (TB, C_in*L)

    # conv1 + bias + ReLU  (f32 accumulation)
    h1 = jnp.dot(x, w1_ref[...], preferred_element_type=f32) + b1_ref[...]
    h1 = jnp.maximum(h1, 0.0)                                             # (TB, W1P)
    p1 = pool_pair(h1).astype(cdt)

    # conv2 + bias + ReLU  (pool1 selection folded into w2)
    h2 = jnp.dot(p1, w2_ref[...], preferred_element_type=f32) + b2_ref[...]
    h2 = jnp.maximum(h2, 0.0)                                             # (TB, W2P)
    p2 = pool_pair(h2).astype(cdt)

    # flatten(1) + linear1 + ReLU  (pool2 selection + flatten order folded into l1)
    hf = jnp.dot(p2, l1_ref[...], preferred_element_type=f32) + lb1_ref[...]
    hf = jnp.maximum(hf, 0.0).astype(cdt)                                 # (TB, N1)

    # linear2 + ReLU (module applies ReLU on the output, matching F.relu(self.linear2(x)))
    out = jnp.dot(hf, l2_ref[...], preferred_element_type=f32) + lb2_ref[...]
    o_ref[...] = jnp.maximum(out, 0.0).astype(o_ref.dtype)


# ----------------------------------------------------------------------------
# One-time parameter prep (all layout transforms happen here, outside the hot path)
# ----------------------------------------------------------------------------
def _conv1d_matrix(w, L_in, pad):
    """Dense block-Toeplitz matrix for Conv1d.

    w: (C_out, C_in, K) torch layout.  Returns M of shape (C_in*L_in, C_out*L_out)
    with M[ci*L_in + l_in, co*L_out + l_out] = w[co, ci, l_in - l_out + pad] (0 outside).
    """
    C_out, C_in, K = w.shape
    L_out = L_in + 2 * pad - K + 1
    w = np.asarray(w, np.float32)
    k = np.arange(L_in)[:, None] - np.arange(L_out)[None, :] + pad        # (L_in, L_out)
    valid = (k >= 0) & (k < K)
    kc = np.clip(k, 0, K - 1)
    g = w[:, :, kc] * valid[None, None]                                   # (C_out,C_in,L_in,L_out)
    return np.transpose(g, (1, 2, 0, 3)).reshape(C_in * L_in, C_out * L_out)


def _pool_scatter_rows(M, C, L_half):
    """Fold MaxPool(2,2) even-lane selection into the next layer's weights.

    M: (C*L_half, F) with rows ordered c*L_half + j.  Returns (C*2*L_half, F) with
    out[c*2*L_half + 2*j] = M[c*L_half + j] and zeros at odd offsets.
    """
    F = M.shape[1]
    out = np.zeros((C * 2 * L_half, F), np.float32)
    rows = (np.arange(C)[:, None] * (2 * L_half) + 2 * np.arange(L_half)[None, :]).reshape(-1)
    out[rows] = M
    return out


def _round_up(n, m=128):
    return ((n + m - 1) // m) * m


def prepare_params(tp, L, dtype=jnp.bfloat16):
    """tp holds PyTorch-layout params: conv (O, I, K), linear (out, in). L = input length."""
    w1 = np.asarray(tp["conv1_w"], np.float32)
    b1 = np.asarray(tp["conv1_b"], np.float32)
    w2 = np.asarray(tp["conv2_w"], np.float32)
    b2 = np.asarray(tp["conv2_b"], np.float32)
    lw1 = np.asarray(tp["lin1_w"], np.float32)          # (N1, flattened)
    lb1 = np.asarray(tp["lin1_b"], np.float32)
    lw2 = np.asarray(tp["lin2_w"], np.float32)          # (N2, N1)
    lb2 = np.asarray(tp["lin2_b"], np.float32)

    C_hid, C_in, K = w1.shape
    C_out = w2.shape[0]
    assert K % 2 == 1, "symmetric 'same' padding requires an odd kernel size"
    pad = (K - 1) // 2

    Lc1 = L + 2 * pad - K + 1                            # conv1 output length
    assert Lc1 % 2 == 0, "MaxPool1d(2,2) pairing requires even conv1 length"
    L1 = Lc1 // 2
    Lc2 = L1 + 2 * pad - K + 1                           # conv2 output length
    assert Lc2 % 2 == 0, "MaxPool1d(2,2) pairing requires even conv2 length"
    L2 = Lc2 // 2
    assert lw1.shape[1] == C_out * L2, "flattened_size does not match conv/pool output"

    W1P = _round_up(C_hid * Lc1)                         # lane-dense padded widths
    W2P = _round_up(C_out * Lc2)

    # conv1 as dense matrix, columns zero-padded to a multiple of 128 lanes.
    M1 = _conv1d_matrix(w1, L, pad)                                      # (C_in*L, C_hid*Lc1)
    M1 = np.pad(M1, ((0, 0), (0, W1P - C_hid * Lc1)))
    B1 = np.pad(np.repeat(b1, Lc1), (0, W1P - C_hid * Lc1)).reshape(1, W1P)

    # conv2 matrix on the pooled length, rows scattered to the even lanes of layer-1
    # feature space (pool1 selection folded in), rows/cols padded.
    M2 = _conv1d_matrix(w2, L1, pad)                                     # (C_hid*L1, C_out*Lc2)
    M2 = _pool_scatter_rows(M2, C_hid, L1)                               # (C_hid*Lc1, C_out*Lc2)
    M2 = np.pad(M2, ((0, W1P - C_hid * Lc1), (0, W2P - C_out * Lc2)))
    B2 = np.pad(np.repeat(b2, Lc2), (0, W2P - C_out * Lc2)).reshape(1, W2P)

    # linear1 as (in, out); its input rows are already in PyTorch flatten(1) order
    # (c-major, l-minor), scattered to the even lanes of layer-2 feature space.
    Ml1 = _pool_scatter_rows(lw1.T, C_out, L2)                           # (C_out*Lc2, N1)
    Ml1 = np.pad(Ml1, ((0, W2P - C_out * Lc2), (0, 0)))

    return {
        "w1": jnp.asarray(M1, dtype), "b1": jnp.asarray(B1, jnp.float32),
        "w2": jnp.asarray(M2, dtype), "b2": jnp.asarray(B2, jnp.float32),
        "l1": jnp.asarray(Ml1, dtype), "lb1": jnp.asarray(lb1.reshape(1, -1), jnp.float32),
        "l2": jnp.asarray(lw2.T, dtype), "lb2": jnp.asarray(lb2.reshape(1, -1), jnp.float32),
    }


# ----------------------------------------------------------------------------
# Wrapper: batch-tile grid, resident weights, parallel grid axis (megacore on v7x)
# ----------------------------------------------------------------------------
@functools.partial(jax.jit, static_argnames=("tb",))
def convolution_nn_forward(x_ncl, params, *, tb=256):
    """x_ncl: (B, C_in, L) in PyTorch NCL layout.  Returns (B, out_dim) float32."""
    B, C_in, L = x_ncl.shape
    assert C_in * L == params["w1"].shape[0], "input shape does not match prepared params"
    n_out = params["lb2"].shape[1]

    # Batch tile: the matmul M dimension.  tb=256 matches one MXU pass on v6e/v7x
    # (multiples of 128 suffice on v5e); clamp for small batches.
    TB = min(tb, B)
    grid = (pl.cdiv(B, TB),)

    x2 = x_ncl.reshape(B, C_in * L)       # contiguous reshape (c-major, l-minor lanes)

    def resident(arr):                    # constant index_map -> stays in VMEM across steps
        return pl.BlockSpec(arr.shape, lambda i: (0, 0))

    return pl.pallas_call(
        fused_cnn_kernel,
        out_shape=jax.ShapeDtypeStruct((B, n_out), jnp.float32),
        grid=grid,
        in_specs=[
            pl.BlockSpec((TB, C_in * L), lambda i: (i, 0)),      # streamed input block
            resident(params["w1"]), resident(params["b1"]),
            resident(params["w2"]), resident(params["b2"]),
            resident(params["l1"]), resident(params["lb1"]),
            resident(params["l2"]), resident(params["lb2"]),
        ],
        out_specs=pl.BlockSpec((TB, n_out), lambda i: (i, 0)),
        compiler_params=pltpu.CompilerParams(dimension_semantics=("parallel",)),
    )(x2, params["w1"], params["b1"], params["w2"], params["b2"],
      params["l1"], params["lb1"], params["l2"], params["lb2"])


# ----------------------------------------------------------------------------
# Pure-JAX reference (correctness check of the Pallas lowering)
# ----------------------------------------------------------------------------
def reference_forward(x_ncl, tp, pad=1):
    def conv_relu_pool(x, w, b):
        y = lax.conv_general_dilated(
            x, w, window_strides=(1,), padding=[(pad, pad)],
            dimension_numbers=("NCW", "OIW", "NCW")) + b[None, :, None]
        y = jnp.maximum(y, 0.0)
        Bb, Cc, Lc = y.shape
        return y.reshape(Bb, Cc, Lc // 2, 2).max(axis=-1)

    x = conv_relu_pool(x_ncl, tp["conv1_w"], tp["conv1_b"])
    x = conv_relu_pool(x, tp["conv2_w"], tp["conv2_b"])
    x = x.reshape(x.shape[0], -1)                       # torch.flatten(x, 1)
    x = jnp.maximum(x @ tp["lin1_w"].T + tp["lin1_b"], 0.0)
    x = jnp.maximum(x @ tp["lin2_w"].T + tp["lin2_b"], 0.0)
    return x


def _check(name, out, ref, atol, rtol):
    if not bool(jnp.allclose(out, ref, atol=atol, rtol=rtol)):
        raise AssertionError(f"{name}: max abs err = {float(jnp.max(jnp.abs(out - ref)))}")


if __name__ == "__main__":
    B, C_in, L = 2, 4, 16
    C_hid, C_out = 8, 8                  # default_layer, output_dimension (conv channels)
    K = 3
    flattened_size = C_out * (L // 4)    # 32 after two MaxPool1d(2,2) stages
    linear_layer = 32
    out_dim = 8

    key = jax.random.PRNGKey(0)
    ks = jax.random.split(key, 9)
    # PyTorch-layout parameters: Conv1d (O, I, K), Linear (out, in).
    torch_params = {
        "conv1_w": 0.1 * jax.random.normal(ks[0], (C_hid, C_in, K), jnp.float32),
        "conv1_b": 0.1 * jax.random.normal(ks[1], (C_hid,), jnp.float32),
        "conv2_w": 0.1 * jax.random.normal(ks[2], (C_out, C_hid, K), jnp.float32),
        "conv2_b": 0.1 * jax.random.normal(ks[3], (C_out,), jnp.float32),
        "lin1_w": 0.1 * jax.random.normal(ks[4], (linear_layer, flattened_size), jnp.float32),
        "lin1_b": 0.1 * jax.random.normal(ks[5], (linear_layer,), jnp.float32),
        "lin2_w": 0.1 * jax.random.normal(ks[6], (out_dim, linear_layer), jnp.float32),
        "lin2_b": 0.1 * jax.random.normal(ks[7], (out_dim,), jnp.float32),
    }
    x = jax.random.normal(ks[8], (B, C_in, L), jnp.float32)
    ref = reference_forward(x, torch_params)

    # 1) f32 weights: bit-for-bit-ish check of the fused lowering.
    p_f32 = prepare_params(torch_params, L, dtype=jnp.float32)
    out_f32 = jax.block_until_ready(convolution_nn_forward(x, p_f32, tb=256))
    assert out_f32.shape == (B, out_dim), out_f32.shape
    _check("f32 small-batch", out_f32, ref, atol=1e-4, rtol=1e-4)

    # 2) bf16 weights/activations with f32 accumulation (production config).
    p_bf16 = prepare_params(torch_params, L, dtype=jnp.bfloat16)
    out_bf16 = jax.block_until_ready(convolution_nn_forward(x, p_bf16, tb=256))
    _check("bf16 small-batch", out_bf16, ref, atol=5e-2, rtol=5e-2)

    # 3) Larger batch to exercise the batch-tile grid + parallel axis (4 grid steps).
    xb = jax.random.normal(jax.random.PRNGKey(1), (512, C_in, L), jnp.float32)
    refb = reference_forward(xb, torch_params)
    outb = jax.block_until_ready(convolution_nn_forward(xb, p_f32, tb=128))
    _check("f32 batched grid", outb, refb, atol=1e-4, rtol=1e-4)

    print("KERNEL_OK")
</pallas_src>

<mosaic_0001>
module attributes {stable_mosaic.version = 11 : i64} {
  func.func @fused_cnn_kernel(%arg0: i32, %arg1: memref<2x64xf32, #tpu.memory_space<vmem>>, %arg2: memref<64x128xf32, #tpu.memory_space<vmem>>, %arg3: memref<1x128xf32, #tpu.memory_space<vmem>>, %arg4: memref<128x128xf32, #tpu.memory_space<vmem>>, %arg5: memref<1x128xf32, #tpu.memory_space<vmem>>, %arg6: memref<128x32xf32, #tpu.memory_space<vmem>>, %arg7: memref<1x32xf32, #tpu.memory_space<vmem>>, %arg8: memref<32x8xf32, #tpu.memory_space<vmem>>, %arg9: memref<1x8xf32, #tpu.memory_space<vmem>>, %arg10: memref<2x8xf32, #tpu.memory_space<vmem>>) attributes {dimension_semantics = [#tpu.dimension_semantics<parallel>], iteration_bounds = array<i64: 1>, scalar_prefetch = 0 : i64, scratch_operands = 0 : i64, tpu.core_type = #tpu.core_type<tc>, window_params = [{transform_indices = @transform_0, window_bounds = array<i64: 2, 64>}, {pipeline_mode = #tpu.pipeline_mode<synchronous>, transform_indices = @transform_1, window_bounds = array<i64: 64, 128>}, {pipeline_mode = #tpu.pipeline_mode<synchronous>, transform_indices = @transform_2, window_bounds = array<i64: 1, 128>}, {pipeline_mode = #tpu.pipeline_mode<synchronous>, transform_indices = @transform_3, window_bounds = array<i64: 128, 128>}, {pipeline_mode = #tpu.pipeline_mode<synchronous>, transform_indices = @transform_4, window_bounds = array<i64: 1, 128>}, {pipeline_mode = #tpu.pipeline_mode<synchronous>, transform_indices = @transform_5, window_bounds = array<i64: 128, 32>}, {pipeline_mode = #tpu.pipeline_mode<synchronous>, transform_indices = @transform_6, window_bounds = array<i64: 1, 32>}, {pipeline_mode = #tpu.pipeline_mode<synchronous>, transform_indices = @transform_7, window_bounds = array<i64: 32, 8>}, {pipeline_mode = #tpu.pipeline_mode<synchronous>, transform_indices = @transform_8, window_bounds = array<i64: 1, 8>}, {transform_indices = @transform_9, window_bounds = array<i64: 2, 8>}]} {
    %c0 = arith.constant 0 : index
    %c0_0 = arith.constant 0 : index
    %0 = vector.load %arg1[%c0, %c0_0] : memref<2x64xf32, #tpu.memory_space<vmem>>, vector<2x64xf32>
    %c0_1 = arith.constant 0 : index
    %c0_2 = arith.constant 0 : index
    %1 = vector.load %arg2[%c0_1, %c0_2] : memref<64x128xf32, #tpu.memory_space<vmem>>, vector<64x128xf32>
    %cst = arith.constant dense<0.000000e+00> : vector<2x128xf32>
    %2 = tpu.matmul %0, %1, %cst {dimension_numbers = #tpu.dot_dimension_numbers<[1], [0], [0], [1], [0, 0, 1, 1], [], []>} : vector<2x64xf32>, vector<64x128xf32>, vector<2x128xf32> -> vector<2x128xf32>
    %c0_3 = arith.constant 0 : index
    %c0_4 = arith.constant 0 : index
    %3 = vector.load %arg3[%c0_3, %c0_4] : memref<1x128xf32, #tpu.memory_space<vmem>>, vector<1x128xf32>
    %4 = vector.broadcast %3 : vector<1x128xf32> to vector<2x128xf32>
    %5 = arith.addf %2, %4 : vector<2x128xf32>
    %cst_5 = arith.constant 0.000000e+00 : f32
    %6 = vector.broadcast %cst_5 : f32 to vector<2x128xf32>
    %7 = arith.maximumf %5, %6 : vector<2x128xf32>
    %c127_i32 = arith.constant 127 : i32
    %8 = tpu.dynamic_rotate %7 by %c127_i32 dim 1 : vector<2x128xf32>, i32 -> vector<2x128xf32>
    %9 = arith.maximumf %7, %8 : vector<2x128xf32>
    %c0_6 = arith.constant 0 : index
    %c0_7 = arith.constant 0 : index
    %10 = vector.load %arg4[%c0_6, %c0_7] : memref<128x128xf32, #tpu.memory_space<vmem>>, vector<128x128xf32>
    %cst_8 = arith.constant dense<0.000000e+00> : vector<2x128xf32>
    %11 = tpu.matmul %9, %10, %cst_8 {dimension_numbers = #tpu.dot_dimension_numbers<[1], [0], [0], [1], [0, 0, 1, 1], [], []>} : vector<2x128xf32>, vector<128x128xf32>, vector<2x128xf32> -> vector<2x128xf32>
    %c0_9 = arith.constant 0 : index
    %c0_10 = arith.constant 0 : index
    %12 = vector.load %arg5[%c0_9, %c0_10] : memref<1x128xf32, #tpu.memory_space<vmem>>, vector<1x128xf32>
    %13 = vector.broadcast %12 : vector<1x128xf32> to vector<2x128xf32>
    %14 = arith.addf %11, %13 : vector<2x128xf32>
    %cst_11 = arith.constant 0.000000e+00 : f32
    %15 = vector.broadcast %cst_11 : f32 to vector<2x128xf32>
    %16 = arith.maximumf %14, %15 : vector<2x128xf32>
    %c127_i32_12 = arith.constant 127 : i32
    %17 = tpu.dynamic_rotate %16 by %c127_i32_12 dim 1 : vector<2x128xf32>, i32 -> vector<2x128xf32>
    %18 = arith.maximumf %16, %17 : vector<2x128xf32>
    %c0_13 = arith.constant 0 : index
    %c0_14 = arith.constant 0 : index
    %19 = vector.load %arg6[%c0_13, %c0_14] : memref<128x32xf32, #tpu.memory_space<vmem>>, vector<128x32xf32>
    %cst_15 = arith.constant dense<0.000000e+00> : vector<2x32xf32>
    %20 = tpu.matmul %18, %19, %cst_15 {dimension_numbers = #tpu.dot_dimension_numbers<[1], [0], [0], [1], [0, 0, 1, 1], [], []>} : vector<2x128xf32>, vector<128x32xf32>, vector<2x32xf32> -> vector<2x32xf32>
    %c0_16 = arith.constant 0 : index
    %c0_17 = arith.constant 0 : index
    %21 = vector.load %arg7[%c0_16, %c0_17] : memref<1x32xf32, #tpu.memory_space<vmem>>, vector<1x32xf32>
    %22 = vector.broadcast %21 : vector<1x32xf32> to vector<2x32xf32>
    %23 = arith.addf %20, %22 : vector<2x32xf32>
    %cst_18 = arith.constant 0.000000e+00 : f32
    %24 = vector.broadcast %cst_18 : f32 to vector<2x32xf32>
    %25 = arith.maximumf %23, %24 : vector<2x32xf32>
    %c0_19 = arith.constant 0 : index
    %c0_20 = arith.constant 0 : index
    %26 = vector.load %arg8[%c0_19, %c0_20] : memref<32x8xf32, #tpu.memory_space<vmem>>, vector<32x8xf32>
    %cst_21 = arith.constant dense<0.000000e+00> : vector<2x8xf32>
    %27 = tpu.matmul %25, %26, %cst_21 {dimension_numbers = #tpu.dot_dimension_numbers<[1], [0], [0], [1], [0, 0, 1, 1], [], []>} : vector<2x32xf32>, vector<32x8xf32>, vector<2x8xf32> -> vector<2x8xf32>
    %c0_22 = arith.constant 0 : index
    %c0_23 = arith.constant 0 : index
    %28 = vector.load %arg9[%c0_22, %c0_23] : memref<1x8xf32, #tpu.memory_space<vmem>>, vector<1x8xf32>
    %29 = vector.broadcast %28 : vector<1x8xf32> to vector<2x8xf32>
    %30 = arith.addf %27, %29 : vector<2x8xf32>
    %cst_24 = arith.constant 0.000000e+00 : f32
    %31 = vector.broadcast %cst_24 : f32 to vector<2x8xf32>
    %32 = arith.maximumf %30, %31 : vector<2x8xf32>
    %c0_25 = arith.constant 0 : index
    %c0_26 = arith.constant 0 : index
    %33 = vector.load %arg10[%c0_25, %c0_26] : memref<2x8xf32, #tpu.memory_space<vmem>>, vector<2x8xf32>
    tpu.vector_store %arg10[%c0_25, %c0_26], %32 {strides = array<i32>} : memref<2x8xf32, #tpu.memory_space<vmem>>, vector<2x8xf32>,
    return
  }
  func.func @transform_0(%arg0: i32) -> (i32, i32) {
    %c0_i32 = arith.constant 0 : i32
    %c0_i32_0 = arith.constant 0 : i32
    return %arg0, %c0_i32 : i32, i32
  }
  func.func @transform_1(%arg0: i32) -> (i32, i32) {
    %c0_i32 = arith.constant 0 : i32
    %c0_i32_0 = arith.constant 0 : i32
    %c0_i32_1 = arith.constant 0 : i32
    return %c0_i32, %c0_i32_0 : i32, i32
  }
  func.func @transform_2(%arg0: i32) -> (i32, i32) {
    %c0_i32 = arith.constant 0 : i32
    %c0_i32_0 = arith.constant 0 : i32
    %c0_i32_1 = arith.constant 0 : i32
    return %c0_i32, %c0_i32_0 : i32, i32
  }
  func.func @transform_3(%arg0: i32) -> (i32, i32) {
    %c0_i32 = arith.constant 0 : i32
    %c0_i32_0 = arith.constant 0 : i32
    %c0_i32_1 = arith.constant 0 : i32
    return %c0_i32, %c0_i32_0 : i32, i32
  }
  func.func @transform_4(%arg0: i32) -> (i32, i32) {
    %c0_i32 = arith.constant 0 : i32
    %c0_i32_0 = arith.constant 0 : i32
    %c0_i32_1 = arith.constant 0 : i32
    return %c0_i32, %c0_i32_0 : i32, i32
  }
  func.func @transform_5(%arg0: i32) -> (i32, i32) {
    %c0_i32 = arith.constant 0 : i32
    %c0_i32_0 = arith.constant 0 : i32
    %c0_i32_1 = arith.constant 0 : i32
    return %c0_i32, %c0_i32_0 : i32, i32
  }
  func.func @transform_6(%arg0: i32) -> (i32, i32) {
    %c0_i32 = arith.constant 0 : i32
    %c0_i32_0 = arith.constant 0 : i32
    %c0_i32_1 = arith.constant 0 : i32
    return %c0_i32, %c0_i32_0 : i32, i32
  }
  func.func @transform_7(%arg0: i32) -> (i32, i32) {
    %c0_i32 = arith.constant 0 : i32
    %c0_i32_0 = arith.constant 0 : i32
    %c0_i32_1 = arith.constant 0 : i32
    return %c0_i32, %c0_i32_0 : i32, i32
  }
  func.func @transform_8(%arg0: i32) -> (i32, i32) {
    %c0_i32 = arith.constant 0 : i32
    %c0_i32_0 = arith.constant 0 : i32
    %c0_i32_1 = arith.constant 0 : i32
    return %c0_i32, %c0_i32_0 : i32, i32
  }
  func.func @transform_9(%arg0: i32) -> (i32, i32) {
    %c0_i32 = arith.constant 0 : i32
    %c0_i32_0 = arith.constant 0 : i32
    return %arg0, %c0_i32 : i32, i32
  }
}

</mosaic_0001>

<bundles_post_ra>
// kernel: convolution_nn_forward.1
= control target key start
LH: loop header
LB: loop body
LE: loop exit
PB: predicated region body
PF: predicated region fallthrough
CT: control target
= control target key end

     0   :  { %v669_v3 = vmov 0.0|0.0   ;;  %vm670_vm0 = vmmov 0   ;;  %v671_v6 = vmov 0.0   ;;  %s915_s0 = inlined_call_operand.vmem [shape: f32[2,64], index: 0, kind: input, shape index: {}]   ;;  %s916_s1 = inlined_call_operand.vmem [shape: f32[64,128], index: 1, kind: input, shape index: {}]   ;;  %s917_s2 = inlined_call_operand.vmem [shape: f32[1,128], index: 2, kind: input, shape index: {}]   ;;  %s918_s3 = inlined_call_operand.vmem [shape: f32[128,128], index: 3, kind: input, shape index: {}]   ;;  %s919_s4 = inlined_call_operand.vmem [shape: f32[1,128], index: 4, kind: input, shape index: {}]   ;;  %s920_s5 = inlined_call_operand.vmem [shape: f32[128,32], index: 5, kind: input, shape index: {}]   ;;  %s921_s6 = inlined_call_operand.vmem [shape: f32[1,32], index: 6, kind: input, shape index: {}]   ;;  %s922_s7 = inlined_call_operand.vmem [shape: f32[32,8], index: 7, kind: input, shape index: {}]   ;;  %s923_s8 = inlined_call_operand.vmem [shape: f32[1,8], index: 8, kind: input, shape index: {}]   ;;  %s924_s9 = inlined_call_operand.hbm [shape: f32[2,8], index: 9, kind: output, shape index: {}]  }
   0x1   :  { %v34_v0 = vld [vmem:[%s916_s1] sm:$0xff]  ;;  %v35_v1 = vld [vmem:[%s916_s1 + $0x8] sm:$0xff]  ;;  %v36_v2 = vld [vmem:[%s916_s1 + $0x10] sm:$0xff]  ;;  %574 = vmatprep.subr.bf16.mxu0 %v669_v3  ;;  %490 = vmatprep.mubr.msk.f32.mxu0 %vm670_vm0, %v671_v6 }
   0x2   :  { %v575_v4 = vpack.c.bf16 %v35_v1, %v34_v0  ;;  %v37_v5 = vld [vmem:[%s916_s1 + $0x18] sm:$0xff]  ;;  %586 = vmatprep.subr.bf16.mxu1 %v669_v3  ;;  %525 = vmatprep.mubr.msk.f32.mxu1 %vm670_vm0, %v671_v6 }
   0x3   :  { %v578_v7 = vpack.c.bf16 %v37_v5, %v36_v2 }
   0x4   :  { %576 = vmatpush3.bf16.msra.mxu0 %v575_v4 }
   0x5   :  { %14 = vsyncpa [#allocation3], 0  ;;  %577 = vmatprep.subr.bf16.mxu0 %v669_v3  ;;  %v38_v8 = vld [vmem:[%s916_s1 + $0x20] sm:$0xff]  ;;  %v39_v9 = vld [vmem:[%s916_s1 + $0x28] sm:$0xff]  ;;  %vm49_vm1 = vcmask 523264   ;;  %s672_s15 = smov 127  }
   0x6   :  { %v581_v10 = vpack.c.bf16 %v39_v9, %v38_v8  ;;  %v40_v11 = vld [vmem:[%s916_s1 + $0x30] sm:$0xff]  ;;  %v41_v12 = vld [vmem:[%s916_s1 + $0x38] sm:$0xff]  ;;  %v33_v14 = vld [vmem:[%s915_s0] sm:$0x3]  ;;  %vm329_vm2 = vcmask 261120   ;;  %s673_s0 = smov [#allocation2]  }
   0x7   :  { %v584_v13 = vpack.c.bf16 %v41_v12, %v40_v11  ;;  %v127_v15 = vld [vmem:[%s918_s3] sm:$0xff]  ;;  %v128_v16 = vld [vmem:[%s918_s3 + $0x8] sm:$0xff]  ;;  %v129_v17 = vld [vmem:[%s918_s3 + $0x10] sm:$0xff]  ;;  %s412_s11 = sshll.u32 %s673_s0, 4  ;;  %vm404_vm3 = vcmask 58368   ;;  %s413_s11 = int_to_ptr.vmem [resolvable:$true] %s412_s11 }
   0x8   :  { %579 = vmatpush3.bf16.msra.mxu0 %v578_v7  ;;  %v587_v18 = vpack.c.bf16 %v128_v16, %v127_v15  ;;  %v130_v19 = vld [vmem:[%s918_s3 + $0x18] sm:$0xff]  ;;  %v131_v21 = vld [vmem:[%s918_s3 + $0x20] sm:$0xff]  ;;  %v132_v22 = vld [vmem:[%s918_s3 + $0x28] sm:$0xff]  ;;  %p650_p1 = scmp.lt.s32.totalorder %s413_s11, %s413_s11 }
   0x9   :  { %580 = vmatprep.subr.bf16.mxu0 %v669_v3  ;;  %v590_v20 = vpack.c.bf16 %v130_v19, %v129_v17  ;;  %v593_v23 = vpack.c.bf16 %v132_v22, %v131_v21  ;;  %v133_v24 = vld [vmem:[%s918_s3 + $0x30] sm:$0xff]  ;;  %v134_v25 = vld [vmem:[%s918_s3 + $0x38] sm:$0xff]  ;;  %v135_v27 = vld [vmem:[%s918_s3 + $0x40] sm:$0xff] }
   0xa   :  { %588 = vmatpush3.bf16.msra.mxu1 %v587_v18  ;;  %v596_v26 = vpack.c.bf16 %v134_v25, %v133_v24  ;;  %v136_v28 = vld [vmem:[%s918_s3 + $0x48] sm:$0xff]  ;;  %v137_v30 = vld [vmem:[%s918_s3 + $0x50] sm:$0xff]  ;;  %v138_v31 = vld [vmem:[%s918_s3 + $0x58] sm:$0xff] }
   0xb   :  { %589 = vmatprep.subr.bf16.mxu1 %v669_v3  ;;  %v599_v29 = vpack.c.bf16 %v136_v28, %v135_v27  ;;  %v602_v32 = vpack.c.bf16 %v138_v31, %v137_v30  ;;  %v139_v33 = vld [vmem:[%s918_s3 + $0x60] sm:$0xff]  ;;  %v140_v34 = vld [vmem:[%s918_s3 + $0x68] sm:$0xff]  ;;  %v141_v36 = vld [vmem:[%s918_s3 + $0x70] sm:$0xff] }
   0xc   :  { %582 = vmatpush3.bf16.msra.mxu0 %v581_v10  ;;  %v605_v35 = vpack.c.bf16 %v140_v34, %v139_v33  ;;  %v142_v37 = vld [vmem:[%s918_s3 + $0x78] sm:$0xff]  ;;  %v420_v39 = vld [vmem:[%s917_s2] ss:$0 sm:$0xff]  ;;  %v225_v47 = vld [vmem:[%s920_s5 + $0x8] sm:$0xff] }
   0xd   :  { %583 = vmatprep.subr.bf16.mxu0 %v669_v3  ;;  %v608_v38 = vpack.c.bf16 %v142_v37, %v141_v36  ;;  %v224_v46 = vld [vmem:[%s920_s5] sm:$0xff]  ;;  %v226_v48 = vld [vmem:[%s920_s5 + $0x10] sm:$0xff]  ;;  %v227_v50 = vld [vmem:[%s920_s5 + $0x18] sm:$0xff] }
   0xe   :  { %591 = vmatpush3.bf16.msra.mxu1 %v590_v20  ;;  %v611_v49 = vpack.c.bf16 %v225_v47, %v224_v46  ;;  %v614_v51 = vpack.c.bf16 %v227_v50, %v226_v48  ;;  %v228_v52 = vld [vmem:[%s920_s5 + $0x20] sm:$0xff]  ;;  %v229_v53 = vld [vmem:[%s920_s5 + $0x28] sm:$0xff]  ;;  %v230_v55 = vld [vmem:[%s920_s5 + $0x30] sm:$0xff] }
   0xf   :  { %592 = vmatprep.subr.bf16.mxu1 %v669_v3  ;;  %v617_v54 = vpack.c.bf16 %v229_v53, %v228_v52  ;;  %v231_v56 = vld [vmem:[%s920_s5 + $0x38] sm:$0xff]  ;;  %v232_v58 = vld [vmem:[%s920_s5 + $0x40] sm:$0xff]  ;;  %v233_v59 = vld [vmem:[%s920_s5 + $0x48] sm:$0xff] }
  0x10   :  { %585 = vmatpush3.bf16.msra.mxu0 %v584_v13  ;;  %v620_v57 = vpack.c.bf16 %v231_v56, %v230_v55  ;;  %v623_v60 = vpack.c.bf16 %v233_v59, %v232_v58  ;;  %v234_v61 = vld [vmem:[%s920_s5 + $0x50] sm:$0xff]  ;;  %v235_v62 = vld [vmem:[%s920_s5 + $0x58] sm:$0xff]  ;;  %v236_v0 = vld [vmem:[%s920_s5 + $0x60] sm:$0xff] }
  0x11   :  { %610 = vmatprep.subr.bf16.mxu0 %v669_v3  ;;  %v626_v63 = vpack.c.bf16 %v235_v62, %v234_v61  ;;  %v237_v1 = vld [vmem:[%s920_s5 + $0x68] sm:$0xff]  ;;  %v238_v4 = vld [vmem:[%s920_s5 + $0x70] sm:$0xff]  ;;  %v239_v5 = vld [vmem:[%s920_s5 + $0x78] sm:$0xff] }
  0x12   :  { %594 = vmatpush3.bf16.msra.mxu1 %v593_v23  ;;  %v629_v2 = vpack.c.bf16 %v237_v1, %v236_v0  ;;  %v318_v7 = vld [vmem:[%s922_s7] sm:$0xff]  ;;  %v319_v8 = vld [vmem:[%s922_s7 + $0x8] sm:$0xff]  ;;  %v320_v17 = vld [vmem:[%s922_s7 + $0x10] sm:$0xff] }
  0x13   :  { %491 = vmatmul.mubr.msk.f32.vlgmr.msra.gmra.mrb[0].mxu0 %vm49_vm1, %v33_v14  ;;  %595 = vmatprep.subr.bf16.mxu1 %v669_v3  ;;  %v635_v9 = vpack.c.bf16 %v319_v8, %v318_v7  ;;  %v422_v10 = vld [vmem:[%s919_s4] ss:$0 sm:$0xff]  ;;  %v321_v18 = vld [vmem:[%s922_s7 + $0x18] sm:$0xff] }
  0x14   :  { %560 = vmatprep.mubr.msk.f32.mxu0 %vm670_vm0, %v671_v6  ;;  %612 = vmatpush3.bf16.msra.mxu0 %v611_v49  ;;  %v638_v19 = vpack.c.bf16 %v321_v18, %v320_v17  ;;  %v424_v24 = vld [vmem:[%s923_s8] ss:$0 sm:$0xff] }
  0x15   :  { %613 = vmatprep.subr.bf16.mxu0 %v669_v3 }
  0x16   :  { %597 = vmatpush3.bf16.msra.mxu1 %v596_v26 }
  0x17   :  { %598 = vmatprep.subr.bf16.mxu1 %v669_v3 }
  0x18   :  { %615 = vmatpush3.bf16.msra.mxu0 %v614_v51 }
  0x19   :  { %616 = vmatprep.subr.bf16.mxu0 %v669_v3 }
  0x1a   :  { %600 = vmatpush3.bf16.msra.mxu1 %v599_v29 }
  0x1b   :  { %601 = vmatprep.subr.bf16.mxu1 %v669_v3 }
  0x1c   :  { %618 = vmatpush3.bf16.msra.mxu0 %v617_v54 }
  0x1d   :  { %619 = vmatprep.subr.bf16.mxu0 %v669_v3 }
  0x1e   :  { %603 = vmatpush3.bf16.msra.mxu1 %v602_v32 }
  0x1f   :  { %604 = vmatprep.subr.bf16.mxu1 %v669_v3 }
  0x20   :  { %621 = vmatpush3.bf16.msra.mxu0 %v620_v57 }
  0x21   :  { %622 = vmatprep.subr.bf16.mxu0 %v669_v3 }
  0x22   :  { %606 = vmatpush3.bf16.msra.mxu1 %v605_v35 }
  0x23   :  { %607 = vmatprep.subr.bf16.mxu1 %v669_v3 }
  0x24   :  { %624 = vmatpush3.bf16.msra.mxu0 %v623_v60 }
  0x25   :  { %625 = vmatprep.subr.bf16.mxu0 %v669_v3 }
  0x26   :  { %609 = vmatpush3.bf16.msra.mxu1 %v608_v38 }
  0x27   :  { %634 = vmatprep.subr.bf16.mxu1 %v669_v3 }
  0x28   :  { %627 = vmatpush3.bf16.msra.mxu0 %v626_v63 }
  0x29   :  { %628 = vmatprep.subr.bf16.mxu0 %v669_v3 }
  0x2c   :  { %630 = vmatpush3.bf16.msra.mxu0 %v629_v2 }
  0x2d   :  { %631 = vmatprep.subr.bf16.mxu0 %v669_v3 }
  0xe6   :  { %v119_v40 = vpop.f32.mrb[0].mxu0 }
  0xe7   :  { %v120_v41 = vadd.f32 %v420_v39, %v119_v40  ;;  %v492_v42 = vpop.f32.mrb[1].mxu0 }
  0xe9   :  { %v123_v43 = vmax.f32 %v120_v41, 0.0 }
  0xeb   :  { %124 = vrot.lane.b32.xlu0 %v123_v43, %s672_s15 }
 0x15d   :  { %v125_v44 = vpop.permute.xlu0 %124 }
 0x15e   :  { %v126_v45 = vmax.f32 %v123_v43, %v125_v44 }
 0x160   :  { %526 = vmatmul.mubr.f32.vlgmr.msra.gmra.mrb[0].mxu1 %v126_v45 }
 0x161   :  { %571 = vmatprep.mubr.msk.f32.mxu1 %vm670_vm0, %v671_v6  ;;  %v632_v6 = vpack.c.bf16 %v239_v5, %v238_v4  ;;  %636 = vmatpush3.bf16.msra.mxu1 %v635_v9 }
 0x162   :  { %637 = vmatprep.subr.bf16.mxu1 %v669_v3  ;;  %v423_v3 = vld [vmem:[%s921_s6] ss:$0 sm:$0xff]  ;;  %s645_s6 = scalar_lea.vmem %s413_s11, 32 }
 0x163   :  { %633 = vmatpush3.bf16.msra.mxu0 %v632_v6  ;;  %p646_p0 = scmp.ne.s32.totalorder %s413_s11, %s645_s6  ;;  %p651_p2 = scmp.lt.s32.totalorder %s645_s6, %s645_s6 }
 0x165   :  { %639 = vmatpush3.bf16.msra.mxu1 %v638_v19  ;;  %p652_p3 = por %p651_p2, %p650_p1 }
 0x167   :  { %p653_p4 = pnand %p652_p3, %p646_p0 }
 0x233   :  { %v216_v11 = vpop.f32.mrb[0].mxu1 }
 0x234   :  { %v217_v12 = vadd.f32 %v422_v10, %v216_v11  ;;  %v527_v13 = vpop.f32.mrb[1].mxu1 }
 0x236   :  { %v220_v14 = vmax.f32 %v217_v12, 0.0 }
 0x238   :  { %221 = vrot.lane.b32.xlu0 %v220_v14, %s672_s15 }
 0x2aa   :  { %v222_v15 = vpop.permute.xlu0 %221 }
 0x2ab   :  { %v223_v16 = vmax.f32 %v220_v14, %v222_v15 }
 0x2ad   :  { %561 = vmatmul.mubr.f32.vlgmr.msra.gmra.mrb[2].mxu0 %v223_v16 }
 0x380   :  { %v313_v20 = vpop.f32.mrb[2].mxu0 }
 0x381   :  { %v314_v21 = vadd.f32 %v423_v3, %v313_v20  ;;  %v562_v22 = vpop.f32.mrb[3].mxu0 }
 0x383   :  { %v317_v23 = vmax.f32 %v314_v21, 0.0 }
 0x385   :  { %572 = vmatmul.mubr.msk.f32.vlgmr.msra.gmra.mrb[2].mxu1 %vm329_vm2, %v317_v23 }
 0x458   :  { %v399_v25 = vpop.f32.mrb[2].mxu1 }
 0x459   :  { %v400_v26 = vadd.f32 %v424_v24, %v399_v25  ;;  %v573_v27 = vpop.f32.mrb[3].mxu1 }
 0x45b   :  { %v403_v28 = vmax.f32 %v400_v26, 0.0 }
 0x45d   :  { %405 = vst.msk [vmem:[#allocation2] sm:$0x3] %vm404_vm3, %v403_v28 }
 0x45e   :  { %656 = shalt.err (!%p653_p4)
}
 0x45f   :  { %s657_s8 = scalar_lea.hbm %s924_s9, 32 }
 0x460   :  { %p658_p5 = scmp.ne.s32.totalorder %s924_s9, %s657_s8  ;;  %p661_p6 = scmp.lt.u32.totalorder %s657_s8, %s924_s9 }
 0x462   :  { %p663_p7 = pnand %p661_p6, %p658_p5 }
 0x464   :  { %666 = shalt.err (!%p663_p7)
}
 0x465   :  { %415 = dma.vmem_to_hbm [thread:$0]  %s413_s11, 32, %s924_s9, [#allocation3]  }
 0x466   :  { %667 = dma.done.wait [#allocation3], 32  }
 0x467   :  { %668 = vsyncadd [#allocation3], 4294967264 }
 0x468   :  { %419 = vsyncpa [#allocation3], 1 }

</bundles_post_ra>
